<compile_context>
chip_gen: v7x
topology: tpu7x:2x2x1
jax: 0.10.0
libtpu: 0.0.40
codegen_flags: <defaults>
</compile_context>

<pallas_src>
import functools

import jax
import jax.numpy as jnp
from jax import lax
from jax.experimental import pallas as pl
from jax.experimental.pallas import tpu as pltpu


def _round_up(a, b):
    return (a + b - 1) // b * b


def _sublane_multiple(itemsize):
    # Minimum second-to-last tile dim per dtype width (f32:8, bf16:16, i8/fp8:32).
    return {4: 8, 2: 16, 1: 32}.get(int(itemsize), 8)


def _vmem_budget_bytes():
    """Per-generation VMEM budget: ~75% of physical capacity, capped at 100 MiB.
    -> ~48 MiB on v7x (64 MiB VMEM), ~96 MiB on v5e/v6e (128 MiB VMEM)."""
    cap = 64 << 20
    try:
        info = pltpu.get_tpu_info()
        cap = int(getattr(info, "vmem_capacity_bytes", cap))
    except Exception:
        pass
    return int(min(cap * 3 // 4, 100 << 20))


def _tile_bytes(tm, tn, tk, n_k, x_item, w_item, o_item):
    """Approximate VMEM for one grid step (double-buffered pipelining)."""
    b = 2 * tm * tk * x_item           # x tile
    b += 2 * 2 * tk * tn * w_item      # act + gate weight tiles
    b += 2 * 2 * tn * w_item           # act + gate bias tiles
    b += 2 * tm * tn * o_item          # output tile
    if n_k > 1:
        b += 2 * tm * tn * 4           # two f32 accumulators (scratch, single copy)
    return b


# ----------------------------------------------------------------------------
# Kernels
# ----------------------------------------------------------------------------
def _glu_kernel(x_ref, wa_ref, ba_ref, wg_ref, bg_ref, out_ref, *, mxu_dtype):
    """Single-K-step kernel: full d_in depth per grid step, no accumulator."""
    x = x_ref[...]
    wa = wa_ref[...]
    wg = wg_ref[...]
    if mxu_dtype is not None:
        x = x.astype(mxu_dtype)
        wa = wa.astype(mxu_dtype)
        wg = wg.astype(mxu_dtype)
    act = jnp.dot(x, wa, preferred_element_type=jnp.float32)
    act = act + ba_ref[...].astype(jnp.float32)
    gate = jnp.dot(x, wg, preferred_element_type=jnp.float32)
    gate = jax.nn.sigmoid(gate + bg_ref[...].astype(jnp.float32))
    out_ref[...] = (act * gate).astype(out_ref.dtype)


def _glu_kernel_ktiled(x_ref, wa_ref, ba_ref, wg_ref, bg_ref, out_ref,
                       acc_a_ref, acc_g_ref, *, mxu_dtype):
    """K-tiled kernel: d_in is split over the trailing 'arbitrary' grid axis
    with f32 accumulator scratch; epilogue runs on the last K step."""
    k = pl.program_id(2)

    @pl.when(k == 0)
    def _():
        acc_a_ref[...] = jnp.zeros_like(acc_a_ref)
        acc_g_ref[...] = jnp.zeros_like(acc_g_ref)

    x = x_ref[...]
    wa = wa_ref[...]
    wg = wg_ref[...]
    if mxu_dtype is not None:
        x = x.astype(mxu_dtype)
        wa = wa.astype(mxu_dtype)
        wg = wg.astype(mxu_dtype)
    acc_a_ref[...] += jnp.dot(x, wa, preferred_element_type=jnp.float32)
    acc_g_ref[...] += jnp.dot(x, wg, preferred_element_type=jnp.float32)

    @pl.when(k == pl.num_programs(2) - 1)
    def _():
        act = acc_a_ref[...] + ba_ref[...].astype(jnp.float32)
        gate = jax.nn.sigmoid(acc_g_ref[...] + bg_ref[...].astype(jnp.float32))
        out_ref[...] = (act * gate).astype(out_ref.dtype)


# ----------------------------------------------------------------------------
# Parameter preparation (one-time, at load) and forward pass
# ----------------------------------------------------------------------------
def prepare_glu_params(w_act, b_act, w_gate, b_gate):
    """One-time padding of the hidden dim to a lane (128) multiple.
    Hoisted out of the forward pass so no per-call weight copies happen."""
    d_in, hidden = w_act.shape
    h_pad = _round_up(hidden, 128)

    def pw(w):
        return jnp.pad(w, ((0, 0), (0, h_pad - hidden))) if h_pad != hidden else w

    def pb(b):
        b = jnp.pad(b, (0, h_pad - hidden)) if h_pad != hidden else b
        return b.reshape(1, h_pad)

    return dict(w_act=pw(w_act), b_act=pb(b_act),
                w_gate=pw(w_gate), b_gate=pb(b_gate))


def glu_forward(x, w_act_p, b_act_p, w_gate_p, b_gate_p, *,
                hidden, tm=None, tn=None, tk=None, mxu_dtype=None):
    """x: [..., d_in]; padded params from prepare_glu_params -> [..., hidden]."""
    orig_shape = x.shape
    d_in = orig_shape[-1]
    h_pad = w_act_p.shape[-1]
    assert w_act_p.shape == (d_in, h_pad) and w_gate_p.shape == (d_in, h_pad)
    assert b_act_p.shape == (1, h_pad) and b_gate_p.shape == (1, h_pad)
    assert hidden <= h_pad and h_pad % 128 == 0

    out_dtype = x.dtype
    x2d = x.reshape(-1, d_in)
    m = x2d.shape[0]

    x_item = x2d.dtype.itemsize
    w_item = w_act_p.dtype.itemsize
    o_item = jnp.dtype(out_dtype).itemsize
    sub = max(_sublane_multiple(x_item), _sublane_multiple(o_item))

    budget = _vmem_budget_bytes()
    fits = functools.partial(_tile_bytes, x_item=x_item, w_item=w_item,
                             o_item=o_item)

    # ---- row tile: as large as practical (<=512) but keep >=2 grid steps so
    #      both v7x TensorCores get work via the "parallel" row axis. --------
    if tm is None:
        tm_eff = min(512, _round_up(m, sub))
        if pl.cdiv(m, tm_eff) < 2 and m > sub:
            tm_eff = _round_up(pl.cdiv(m, 2), sub)
    else:
        tm_eff = _round_up(min(tm, _round_up(m, sub)), sub)

    # ---- hidden tile: prefer full residency (weights DMA'd exactly once);
    #      otherwise a <=512 lane multiple that divides h_pad (hidden OUTER).
    if tn is None:
        tn_eff = 128
        for cand in (h_pad, 512, 384, 256, 128):
            if cand > h_pad or cand % 128 or h_pad % cand:
                continue
            if fits(tm_eff, cand, d_in, 1) <= budget:
                tn_eff = cand
                break
    else:
        tn_eff = tn
        assert tn_eff % 128 == 0 and h_pad % tn_eff == 0

    # ---- K (d_in) tile: only split when the full-depth weight tile blows the
    #      VMEM budget (large d_in, e.g. v7x); uses the accumulator kernel. --
    if tk is None:
        tk_eff = d_in
        if fits(tm_eff, tn_eff, d_in, 1) > budget and d_in % 128 == 0:
            tk_eff = 128
            for cand in range(d_in - 128, 127, -128):
                if d_in % cand:
                    continue
                if fits(tm_eff, tn_eff, cand, 2) <= budget:
                    tk_eff = cand
                    break
        # TODO(synk): for huge d_in that is NOT a multiple of 128, K-splitting
        # would need explicit zero-padding of x/W along d_in; not done here.
    else:
        tk_eff = tk
        assert tk_eff == d_in or (d_in % tk_eff == 0 and tk_eff % 128 == 0)

    n_m = pl.cdiv(m, tm_eff)
    n_h = h_pad // tn_eff
    n_k = pl.cdiv(d_in, tk_eff)

    needed = fits(tm_eff, tn_eff, tk_eff, n_k)
    vmem_limit = budget if needed <= budget else int(needed + (4 << 20))

    if n_k == 1:
        kernel = functools.partial(_glu_kernel, mxu_dtype=mxu_dtype)
        scratch = ()
    else:
        kernel = functools.partial(_glu_kernel_ktiled, mxu_dtype=mxu_dtype)
        scratch = (pltpu.VMEM((tm_eff, tn_eff), jnp.float32),
                   pltpu.VMEM((tm_eff, tn_eff), jnp.float32))

    # Weights are only re-streamed per row tile when K is split.
    w_reads = n_m if n_k > 1 else 1
    cost = pl.CostEstimate(
        flops=2 * 2 * m * d_in * h_pad + 4 * m * h_pad,
        transcendentals=m * h_pad,
        bytes_accessed=int(n_h * m * d_in * x_item
                           + w_reads * 2 * d_in * h_pad * w_item
                           + 2 * h_pad * w_item
                           + m * hidden * o_item),
    )

    # Grid: hidden axis OUTER (weight tile changes only n_h times), rows inner
    # (streamed), reduction (K) innermost.  Output is exact (m, hidden) —
    # partial last blocks are masked by Pallas, no padding/slicing copies.
    out2d = pl.pallas_call(
        kernel,
        out_shape=jax.ShapeDtypeStruct((m, hidden), out_dtype),
        grid_spec=pltpu.PrefetchScalarGridSpec(
            num_scalar_prefetch=0,
            grid=(n_h, n_m, n_k),
            in_specs=[
                pl.BlockSpec((tm_eff, tk_eff), lambda j, i, k: (i, k)),   # x
                pl.BlockSpec((tk_eff, tn_eff), lambda j, i, k: (k, j)),   # W_act
                pl.BlockSpec((1, tn_eff),      lambda j, i, k: (0, j)),   # b_act
                pl.BlockSpec((tk_eff, tn_eff), lambda j, i, k: (k, j)),   # W_gate
                pl.BlockSpec((1, tn_eff),      lambda j, i, k: (0, j)),   # b_gate
            ],
            out_specs=pl.BlockSpec((tm_eff, tn_eff), lambda j, i, k: (i, j)),
            scratch_shapes=scratch,
        ),
        compiler_params=pltpu.CompilerParams(
            dimension_semantics=("parallel", "parallel", "arbitrary"),
            vmem_limit_bytes=vmem_limit,
        ),
        cost_estimate=cost,
    )(x2d, w_act_p, b_act_p, w_gate_p, b_gate_p)

    return out2d.reshape(*orig_shape[:-1], hidden)


def apply_gating_layer(x, w_act, b_act, w_gate, b_gate, **kw):
    """Convenience API mirroring the PyTorch module: returns (out, gate params).
    For repeated calls, use prepare_glu_params() once + glu_forward() (jitted)."""
    hidden = w_act.shape[1]
    p = prepare_glu_params(w_act, b_act, w_gate, b_gate)
    out = glu_forward(x, p["w_act"], p["b_act"], p["w_gate"], p["b_gate"],
                      hidden=hidden, **kw)
    # Mirror PyTorch's (output, gated_layer) return: expose gate params.
    return out, (w_gate, b_gate)


# ----------------------------------------------------------------------------
# Demo / correctness checks
# ----------------------------------------------------------------------------
if __name__ == "__main__":
    key = jax.random.PRNGKey(0)

    def make_params(k, d_in, hidden):
        k_wa, k_ba, k_wg, k_bg = jax.random.split(k, 4)
        bound = 1.0 / (d_in ** 0.5)
        w_a = jax.random.uniform(k_wa, (d_in, hidden), jnp.float32, -bound, bound)
        b_a = jax.random.uniform(k_ba, (hidden,), jnp.float32, -bound, bound)
        w_g = jax.random.uniform(k_wg, (d_in, hidden), jnp.float32, -bound, bound)
        b_g = jax.random.uniform(k_bg, (hidden,), jnp.float32, -bound, bound)
        return w_a, b_a, w_g, b_g

    def ref_glu(x, w_a, b_a, w_g, b_g):
        hp = lax.Precision.HIGHEST
        act = jnp.dot(x, w_a, precision=hp) + b_a
        gate = jax.nn.sigmoid(jnp.dot(x, w_g, precision=hp) + b_g)
        return act * gate

    # --- Test 1: small GRN shapes, fully-resident weights, f32 MXU path -----
    batch, seq, input_dim, hidden_dim = 2, 8, 32, 32
    k1, k2, key = jax.random.split(key, 3)
    x = jax.random.normal(k1, (batch, seq, input_dim), jnp.float32)
    w_a, b_a, w_g, b_g = make_params(k2, input_dim, hidden_dim)

    out, (wg_ret, bg_ret) = apply_gating_layer(x, w_a, b_a, w_g, b_g)
    out = jax.block_until_ready(out)
    ref = ref_glu(x, w_a, b_a, w_g, b_g)
    assert out.shape == (batch, seq, hidden_dim)
    assert jnp.allclose(out, ref, atol=1e-5, rtol=1e-5)

    # Pre-fused / jitted production path: weights padded once at load time.
    p = prepare_glu_params(w_a, b_a, w_g, b_g)
    fwd = jax.jit(functools.partial(glu_forward, hidden=hidden_dim))
    out_j = jax.block_until_ready(
        fwd(x, p["w_act"], p["b_act"], p["w_gate"], p["b_gate"]))
    assert jnp.allclose(out_j, ref, atol=1e-5, rtol=1e-5)

    # --- Test 2: force hidden tiling (hidden outer) + K-axis accumulator ----
    d_in2, hidden2 = 256, 384
    k3, k4, key = jax.random.split(key, 3)
    x2 = jax.random.normal(k3, (batch, seq, d_in2), jnp.float32)
    w_a2, b_a2, w_g2, b_g2 = make_params(k4, d_in2, hidden2)
    out2, _ = apply_gating_layer(x2, w_a2, b_a2, w_g2, b_g2, tn=128, tk=128)
    out2 = jax.block_until_ready(out2)
    ref2 = ref_glu(x2, w_a2, b_a2, w_g2, b_g2)
    assert out2.shape == (batch, seq, hidden2)
    assert jnp.allclose(out2, ref2, atol=1e-4, rtol=1e-4)

    # --- Test 3: bf16 MXU operands (production path on v5e/v6e/v7x) ---------
    out3, _ = apply_gating_layer(x, w_a, b_a, w_g, b_g, mxu_dtype=jnp.bfloat16)
    out3 = jax.block_until_ready(out3)
    assert jnp.allclose(out3, ref, atol=5e-2, rtol=5e-2)

    print("KERNEL_OK")
</pallas_src>

<mosaic_0001>
module attributes {stable_mosaic.version = 11 : i64} {
  func.func @_glu_kernel(%arg0: i32, %arg1: i32, %arg2: i32, %arg3: memref<8x32xf32, #tpu.memory_space<vmem>>, %arg4: memref<32x128xf32, #tpu.memory_space<vmem>>, %arg5: memref<1x128xf32, #tpu.memory_space<vmem>>, %arg6: memref<32x128xf32, #tpu.memory_space<vmem>>, %arg7: memref<1x128xf32, #tpu.memory_space<vmem>>, %arg8: memref<8x128xf32, #tpu.memory_space<vmem>>) attributes {dimension_semantics = [#tpu.dimension_semantics<parallel>, #tpu.dimension_semantics<parallel>, #tpu.dimension_semantics<arbitrary>], iteration_bounds = array<i64: 1, 2, 1>, scalar_prefetch = 0 : i64, scratch_operands = 0 : i64, tpu.core_type = #tpu.core_type<tc>, window_params = [{transform_indices = @transform_0, window_bounds = array<i64: 8, 32>}, {transform_indices = @transform_1, window_bounds = array<i64: 32, 128>}, {transform_indices = @transform_2, window_bounds = array<i64: 1, 128>}, {transform_indices = @transform_3, window_bounds = array<i64: 32, 128>}, {transform_indices = @transform_4, window_bounds = array<i64: 1, 128>}, {transform_indices = @transform_5, window_bounds = array<i64: 8, 128>}]} {
    %c0 = arith.constant 0 : index
    %c0_0 = arith.constant 0 : index
    %0 = vector.load %arg3[%c0, %c0_0] : memref<8x32xf32, #tpu.memory_space<vmem>>, vector<8x32xf32>
    %c0_1 = arith.constant 0 : index
    %c0_2 = arith.constant 0 : index
    %1 = vector.load %arg4[%c0_1, %c0_2] : memref<32x128xf32, #tpu.memory_space<vmem>>, vector<32x128xf32>
    %c0_3 = arith.constant 0 : index
    %c0_4 = arith.constant 0 : index
    %2 = vector.load %arg6[%c0_3, %c0_4] : memref<32x128xf32, #tpu.memory_space<vmem>>, vector<32x128xf32>
    %cst = arith.constant dense<0.000000e+00> : vector<8x128xf32>
    %3 = tpu.matmul %0, %1, %cst {dimension_numbers = #tpu.dot_dimension_numbers<[1], [0], [0], [1], [0, 0, 1, 1], [], []>} : vector<8x32xf32>, vector<32x128xf32>, vector<8x128xf32> -> vector<8x128xf32>
    %c0_5 = arith.constant 0 : index
    %c0_6 = arith.constant 0 : index
    %4 = vector.load %arg5[%c0_5, %c0_6] : memref<1x128xf32, #tpu.memory_space<vmem>>, vector<1x128xf32>
    %5 = vector.broadcast %4 : vector<1x128xf32> to vector<8x128xf32>
    %6 = arith.addf %3, %5 : vector<8x128xf32>
    %cst_7 = arith.constant dense<0.000000e+00> : vector<8x128xf32>
    %7 = tpu.matmul %0, %2, %cst_7 {dimension_numbers = #tpu.dot_dimension_numbers<[1], [0], [0], [1], [0, 0, 1, 1], [], []>} : vector<8x32xf32>, vector<32x128xf32>, vector<8x128xf32> -> vector<8x128xf32>
    %c0_8 = arith.constant 0 : index
    %c0_9 = arith.constant 0 : index
    %8 = vector.load %arg7[%c0_8, %c0_9] : memref<1x128xf32, #tpu.memory_space<vmem>>, vector<1x128xf32>
    %9 = vector.broadcast %8 : vector<1x128xf32> to vector<8x128xf32>
    %10 = arith.addf %7, %9 : vector<8x128xf32>
    %11 = arith.negf %10 : vector<8x128xf32>
    %12 = math.exp %11 : vector<8x128xf32>
    %cst_10 = arith.constant 1.000000e+00 : f32
    %13 = vector.broadcast %cst_10 : f32 to vector<8x128xf32>
    %14 = arith.addf %13, %12 : vector<8x128xf32>
    %15 = arith.divf %13, %14 : vector<8x128xf32>
    %16 = arith.mulf %6, %15 : vector<8x128xf32>
    %c0_11 = arith.constant 0 : index
    %c0_12 = arith.constant 0 : index
    %17 = vector.load %arg8[%c0_11, %c0_12] : memref<8x128xf32, #tpu.memory_space<vmem>>, vector<8x128xf32>
    tpu.vector_store %arg8[%c0_11, %c0_12], %16 {strides = array<i32>} : memref<8x128xf32, #tpu.memory_space<vmem>>, vector<8x128xf32>,
    return
  }
  func.func @transform_0(%arg0: i32, %arg1: i32, %arg2: i32) -> (i32, i32) {
    %c0_i32 = arith.constant 0 : i32
    return %arg1, %arg2 : i32, i32
  }
  func.func @transform_1(%arg0: i32, %arg1: i32, %arg2: i32) -> (i32, i32) {
    %c0_i32 = arith.constant 0 : i32
    return %arg2, %arg0 : i32, i32
  }
  func.func @transform_2(%arg0: i32, %arg1: i32, %arg2: i32) -> (i32, i32) {
    %c0_i32 = arith.constant 0 : i32
    %c0_i32_0 = arith.constant 0 : i32
    return %c0_i32, %arg0 : i32, i32
  }
  func.func @transform_3(%arg0: i32, %arg1: i32, %arg2: i32) -> (i32, i32) {
    %c0_i32 = arith.constant 0 : i32
    return %arg2, %arg0 : i32, i32
  }
  func.func @transform_4(%arg0: i32, %arg1: i32, %arg2: i32) -> (i32, i32) {
    %c0_i32 = arith.constant 0 : i32
    %c0_i32_0 = arith.constant 0 : i32
    return %c0_i32, %arg0 : i32, i32
  }
  func.func @transform_5(%arg0: i32, %arg1: i32, %arg2: i32) -> (i32, i32) {
    %c0_i32 = arith.constant 0 : i32
    return %arg1, %arg0 : i32, i32
  }
}

</mosaic_0001>

<bundles_post_ra>
// kernel: tpu_custom_call.1
= control target key start
LH: loop header
LB: loop body
LE: loop exit
PB: predicated region body
PF: predicated region fallthrough
CT: control target
= control target key end

     0   :  { %10 = vsyncpa [#allocation3], 0  ;;  %s1302_s0 = inlined_call_operand.hbm [shape: f32[16,32], index: 0, kind: input, shape index: {}]   ;;  %s1303_s1 = inlined_call_operand.hbm [shape: f32[32,128], index: 1, kind: input, shape index: {}]   ;;  %s1304_s2 = inlined_call_operand.vmem [shape: f32[1,128], index: 2, kind: input, shape index: {}]   ;;  %s1305_s3 = inlined_call_operand.hbm [shape: f32[32,128], index: 3, kind: input, shape index: {}]   ;;  %s1306_s4 = inlined_call_operand.vmem [shape: f32[1,128], index: 4, kind: input, shape index: {}]   ;;  %s1307_s5 = inlined_call_operand.hbm [shape: f32[16,32], index: 5, kind: output, shape index: {}]  }
   0x1   :  { %12 = vsyncpa [#allocation3 + $0x1], 0 }
   0x2   :  { %13 = vsyncpa [#allocation6], 0 }
   0x3   :  { %14 = vsyncpa [#allocation4], 0 }
   0x4   :  { %16 = vsyncpa [#allocation4 + $0x1], 0  ;;  %s1042_s18 = smov 0   ;;  %s1044_s19 = smov 0  }
   0x5   :  { %s1046_s20 = smov 0   ;;  %s1048_s21 = smov 0  }
   0x6   :  { %s1050_s22 = smov 0   ;;  %s1052_s23 = smov 0  }
   0x7 LB: > { %s669_s24 = sadd.s32 4294967295, %s1001_s23   ;;  %s670_s25 = sadd.s32 4294967294, %s1001_s23   ;;  %s1001_s23 = sphi %s1052_s23, %s22_s23   ;;  %s997_s22 = sphi %s1050_s22, %s1329_s22   ;;  %s993_s21 = sphi %s1048_s21, %s1328_s21   ;;  %s989_s20 = sphi %s1046_s20, %s1327_s20   ;;  %s985_s19 = sphi %s1044_s19, %s1326_s19   ;;  %s981_s18 = sphi %s1042_s18, %s1325_s18  }
   0x8   : > { %p63_p0 = scmp.ne.s32.totalorder %s985_s19, %s981_s18  ;;  %p1076_p1 = scmp.eq.s32.totalorder %s669_s24, 0 }
   0x9   : > { %p1080_p2 = scmp.eq.s32.totalorder %s669_s24, 1  ;;  %p203_p3 = scmp.eq.s32.totalorder %s670_s25, 1 }
   0xa   : > { %s1312_s26 = scalar_select %p1076_p1, 1, 0 }
   0xb   : > { %p1086_p4 = por %p1076_p1, %p63_p0  ;;  %p671_p5 = scmp.ge.s32.totalorder %s1001_s23, 1 }
   0xc   : > { %p1091_p6 = por %p203_p3, %p63_p0  ;;  %p210_p7 = scmp.lt.s32.totalorder %s1001_s23, 3 }
   0xd   : > { %s1314_s28 = scalar_select %p1086_p4, 1, 0 }
   0xe   : > { %s1315_s29 = scalar_select %p1091_p6, 1, 0 }
   0xf   : > { %p1096_p8 = pnand %p671_p5, %p210_p7  ;;  %s1003_s6 = smov [#allocation5]  }
  0x10   : > { %s226_s7 = sshll.u32 %s1003_s6, 4  ;;  %s1004_s9 = smov [#allocation7]   ;;  %s1100_s7 = int_to_ptr.vmem [resolvable:$true] %s226_s7 }
  0x11   : > { %p749_p9 = pneg %p1096_p8  ;;  %s249_s10 = sshll.u32 %s1004_s9, 4  ;;  %s1111_s10 = int_to_ptr.vmem [resolvable:$true] %s249_s10 }
  0x12   : > { %s829_s13 = scalar_lea.hbm %s1303_s1, 512 }
  0x13   : > { %p1107_p11 = pnand %p749_p9, %p1076_p1  ;;  %p830_p12 = scmp.ne.s32.totalorder %s1303_s1, %s829_s13 }
  0x14   : > { %p836_p5 = scmp.lt.u32.totalorder %s829_s13, %s1303_s1 }
  0x15   : > { %p831_p13 = pneg %p1107_p11 }
  0x17   : > { %p832_p0 = pnand %p831_p13, %p830_p12 }
  0x19   : > { %p833_p3 = pneg %p832_p0 }
  0x1b   : > { %p838_p7 = pnand %p836_p5, %p833_p3 }
  0x1d   : > { %841 = shalt.err (!%p838_p7)
}
  0x1e   : > { %s842_s24 = scalar_lea.vmem %s1100_s7, 512  ;;  %p850_p1 = scmp.lt.s32.totalorder %s1100_s7, %s1100_s7 }
  0x1f   : > { %p843_p9 = scmp.ne.s32.totalorder %s1100_s7, %s842_s24  ;;  %p851_p12 = scmp.lt.s32.totalorder %s842_s24, %s842_s24 }
  0x21   : > { %p845_p10 = pnand %p843_p9, %p831_p13  ;;  %p852_p0 = por %p851_p12, %p850_p1 }
  0x23   : > { %p846_p6 = pneg %p845_p10 }
  0x25   : > { %p853_p4 = pnand %p852_p0, %p846_p6 }
  0x27   : > { %856 = shalt.err (!%p853_p4)
}
  0x28   : > { %s1005_s25 = smov 128   ;;  %s1006_s6 = smov 8  }
  0x29   : > { %752 = dma.hbm_to_vmem [thread:$0]  (!%p1107_p11), %s1303_s1, 512, %s1100_s7, [#allocation6], %s1005_s25, %s1005_s25, %s1006_s6  }
  0x2a   : > { %s857_s14 = scalar_lea.hbm %s1305_s3, 512 }
  0x2b   : > { %p858_p1 = scmp.ne.s32.totalorder %s1305_s3, %s857_s14  ;;  %p864_p10 = scmp.lt.u32.totalorder %s857_s14, %s1305_s3 }
  0x2d   : > { %p860_p4 = pnand %p858_p1, %p831_p13 }
  0x2f   : > { %p861_p6 = pneg %p860_p4 }
  0x31   : > { %p866_p3 = pnand %p864_p10, %p861_p6 }
  0x33   : > { %869 = shalt.err (!%p866_p3)
}
  0x34   : > { %s870_s7 = scalar_lea.vmem %s1111_s10, 512  ;;  %p878_p12 = scmp.lt.s32.totalorder %s1111_s10, %s1111_s10 }
  0x35   : > { %p871_p5 = scmp.ne.s32.totalorder %s1111_s10, %s870_s7  ;;  %p879_p0 = scmp.lt.s32.totalorder %s870_s7, %s870_s7 }
  0x37   : > { %p873_p7 = pnand %p871_p5, %p831_p13  ;;  %p880_p1 = por %p879_p0, %p878_p12 }
  0x39   : > { %p874_p9 = pneg %p873_p7 }
  0x3b   : > { %p881_p4 = pnand %p880_p1, %p874_p9 }
  0x3d   : > { %884 = shalt.err (!%p881_p4)
}
  0x3e   : > { %755 = dma.hbm_to_vmem [thread:$0]  (!%p1107_p11), %s1305_s3, 512, %s1111_s10, [#allocation6], %s1005_s25, %s1005_s25, %s1006_s6  }
  0x3f   : > { %s37_s12 = sadd.s32 1, %s997_s22  ;;  %s50_s13 = sadd.s32 1, %s989_s20 }
  0x40   : > { %p39_p13 = scmp.ge.s32.totalorder %s37_s12, 2  ;;  %p57_p6 = scmp.ne.s32.totalorder %s989_s20, %s985_s19 }
  0x41   : > { %p58_p10 = scmp.eq.s32.totalorder %s1001_s23, 0  ;;  %p766_p3 = scmp.lt.s32.totalorder %s1001_s23, 2 }
  0x42   : > { %s1331_s12 = smov (%p39_p13, %s37_s12), 0  ;;  %p1175_p7 = por %p1080_p2, %p57_p6 }
  0x43   : > { %p59_p5 = por %p58_p10, %p57_p6  ;;  %s45_s14 = ssub.s32 %s997_s22, %s1331_s12 }
  0x44   : > { %s1318_s8 = scalar_select %p1175_p7, 1, 0 }
  0x45   : > { %s269_s15 = sand.u32 1, %s989_s20   ;;  %p48_p9 = scmp.eq.s32.totalorder %s45_s14, 0 }
  0x46   : > { %s677_s10 = sshll.u32 %s269_s15, 3  ;;  %s678_s25 = sshll.u32 %s997_s22, 7 }
  0x47   : > { %s1184_s6 = scalar_select %p48_p9, %s989_s20, %s50_s13  }
  0x48   : > { %s1189_s24 = scalar_lea.hbm %s1302_s0, %s678_s25  ;;  %s273_s27 = scalar_lea.vmem [#allocation2], %s677_s10 }
  0x49   : > { %s281_s7 = sshll.u32 %s273_s27, 4  ;;  %p1193_p2 = pnand %p766_p3, %p59_p5  ;;  %s1197_s7 = int_to_ptr.vmem [resolvable:$true] %s281_s7 }
  0x4a   : > { %s270_s11 = scalar_lea.sflag [#allocation3], %s269_s15  ;;  %s885_s13 = scalar_lea.hbm %s1189_s24, 128 }
  0x4b   : > { %p886_p11 = scmp.ne.s32.totalorder %s1189_s24, %s885_s13  ;;  %p887_p12 = pneg %p1193_p2 }
  0x4c   : > { %s890_s25 = scalar_lea.hbm %s1302_s0, 256  ;;  %p891_p4 = scmp.lt.u32.totalorder %s1189_s24, %s1302_s0 }
  0x4d   : > { %p888_p0 = pnand %p887_p12, %p886_p11  ;;  %p892_p13 = scmp.lt.u32.totalorder %s890_s25, %s885_s13 }
  0x4e   : > { %p894_p10 = scmp.lt.u32.totalorder %s885_s13, %s1189_s24 }
  0x4f   : > { %p889_p1 = pneg %p888_p0  ;;  %p893_p6 = por %p892_p13, %p891_p4 }
  0x51   : > { %p895_p3 = por %p894_p10, %p893_p6 }
  0x53   : > { %p896_p5 = pnand %p895_p3, %p889_p1 }
  0x55   : > { %899 = shalt.err (!%p896_p5)
}
  0x56   : > { %s900_s15 = scalar_lea.vmem %s1197_s7, 128  ;;  %s1007_s27 = smov [#allocation2]  }
  0x57   : > { %p901_p9 = scmp.ne.s32.totalorder %s1197_s7, %s900_s15  ;;  %s905_s14 = sshll.u32 %s1007_s27, 4  ;;  %s906_s14 = int_to_ptr.vmem [resolvable:$false] %s905_s14 }
  0x58   : > { %s907_s10 = scalar_lea.vmem %s906_s14, 256  ;;  %p908_p7 = scmp.lt.s32.totalorder %s1197_s7, %s906_s14 }
  0x59   : > { %p903_p11 = pnand %p901_p9, %p887_p12  ;;  %p909_p4 = scmp.lt.s32.totalorder %s907_s10, %s900_s15 }
  0x5b   : > { %p904_p0 = pneg %p903_p11  ;;  %p910_p13 = por %p909_p4, %p908_p7 }
  0x5d   : > { %p911_p6 = pnand %p910_p13, %p904_p0 }
  0x5f   : > { %914 = shalt.err (!%p911_p6)
}
  0x60   : > { %759 = dma.hbm_to_vmem [thread:$0]  (!%p1193_p2), %s1189_s24, 128, %s1197_s7, %s270_s11  }
  0x61   : > { %290 = sbr.rel (%p1096_p8) target bundleno = 375 (0x177), region = 40  ;;  %s1227_s13 = sand.u32 (!%p1096_p8), 1, %s985_s19  }
  0x62   : > { %s680_s25 = sshll.u32 (!%p1096_p8), %s1227_s13, 3  ;;  %s293_s16 = scalar_lea.sflag (!%p1096_p8), [#allocation3], %s1227_s13 }
  0x63   : > { %s296_s17 = scalar_lea.vmem (!%p1096_p8), [#allocation2], %s680_s25  ;;  %p1320_p7 = scmp.ne.s32.totalorder (!%p1096_p8), %s1314_s28, 0 }
  0x68   : > { %968 = dma.done.wait (%p1320_p7), %s293_s16, 128  }
  0x69   : > { %970 = vsyncadd (%p1320_p7), %s293_s16, 4294967168  ;;  %p1321_p2 = scmp.ne.s32.totalorder %s1312_s26, 0 }
  0x6b   : > { %972 = dma.done.wait (%p1321_p2), [#allocation6], 1024  }
  0x6c   : > { %974 = vsyncadd (%p1321_p2), [#allocation6], 4294966272  ;;  %v1008_v0 = vmov 0.0|0.0   ;;  %vm1009_vm0 = vmmov 0   ;;  %v1010_v1 = vmov 0.0   ;;  %v350_v2 = vld [vmem:[#allocation7] sm:$0xff] }
  0x6d   : > { %731 = vmatprep.subr.bf16.mxu1 %v1008_v0  ;;  %722 = vmatprep.mubr.msk.f32.mxu1 %vm1009_vm0, %v1010_v1  ;;  %v351_v3 = vld [vmem:[#allocation7 + $0x8] sm:$0xff]  ;;  %v352_v4 = vld [vmem:[#allocation7 + $0x10] sm:$0xff]  ;;  %v353_v6 = vld [vmem:[#allocation7 + $0x18] sm:$0xff]  ;;  %vm361_vm1 = vcmask 261120   ;;  %s690_s7 = sshll.u32 %s993_s21, 7  ;;  %s336_s9 = scalar_lea.vmem [#allocation8], %s680_s25 }
  0x6e   : > { %725 = vmatprep.subr.bf16.mxu0 %v1008_v0  ;;  %711 = vmatprep.mubr.msk.f32.mxu0 %vm1009_vm0, %v1010_v1  ;;  %v732_v5 = vpack.c.bf16 %v351_v3, %v350_v2  ;;  %v346_v7 = vld [vmem:[#allocation5] sm:$0xff]  ;;  %v347_v8 = vld [vmem:[#allocation5 + $0x8] sm:$0xff]  ;;  %v348_v9 = vld [vmem:[#allocation5 + $0x10] sm:$0xff]  ;;  %v735_v11 = vpack.c.bf16 %v353_v6, %v352_v4  ;;  %s535_s11 = sshll.u32 %s336_s9, 4  ;;  %s1253_s14 = scalar_lea.hbm %s1307_s5, %s690_s7  ;;  %s1255_s11 = int_to_ptr.vmem [resolvable:$true] %s535_s11 }
  0x6f   : > { %v349_v10 = vld [vmem:[#allocation5 + $0x18] sm:$0xff]  ;;  %v726_v12 = vpack.c.bf16 %v347_v8, %v346_v7  ;;  %v686_v15 = vld [vmem:[%s1306_s4] ss:$0 sm:$0xff]  ;;  %s521_s10 = scalar_lea.sflag [#allocation4], %s1227_s13  ;;  %s915_s16 = scalar_lea.vmem %s1255_s11, 128 }
  0x70   : > { %733 = vmatpush3.bf16.msra.mxu1 %v732_v5  ;;  %v729_v13 = vpack.c.bf16 %v349_v10, %v348_v9  ;;  %v345_v14 = vld [vmem:[%s296_s17] sm:$0xff]  ;;  %p916_p8 = scmp.ne.s32.totalorder %s1255_s11, %s915_s16  ;;  %p1322_p12 = scmp.ne.s32.totalorder %s1318_s8, 0 }
  0x71   : > { %734 = vmatprep.subr.bf16.mxu1 %v1008_v0  ;;  %727 = vmatpush3.bf16.msra.mxu0 %v726_v12  ;;  %v684_v24 = vld [vmem:[%s1304_s2] ss:$0 sm:$0xff]  ;;  %s1011_s21 = smov [#allocation8]  }
  0x72   : > { %728 = vmatprep.subr.bf16.mxu0 %v1008_v0  ;;  %p917_p1 = pnand %p916_p8, %p1322_p12  ;;  %s919_s25 = sshll.u32 %s1011_s21, 4  ;;  %s920_s25 = int_to_ptr.vmem [resolvable:$false] %s919_s25 }
  0x73   : > { %s921_s17 = scalar_lea.vmem %s920_s25, 256  ;;  %p922_p3 = scmp.lt.s32.totalorder %s1255_s11, %s920_s25 }
  0x74   : > { %736 = vmatpush3.bf16.msra.mxu1 %v735_v11  ;;  %p918_p10 = pneg %p917_p1  ;;  %p923_p5 = scmp.lt.s32.totalorder %s921_s17, %s915_s16 }
  0x75   : > { %730 = vmatpush3.bf16.msra.mxu0 %v729_v13 }
  0x76   : > { %p924_p9 = por %p923_p5, %p922_p3 }
  0x77   : > { %723 = vmatmul.mubr.msk.f32.vlgmr.msra.gmra.mrb[0].mxu1 %vm361_vm1, %v345_v14 }
  0x78   : > { %712 = vmatmul.mubr.msk.f32.vlgmr.msra.gmra.mrb[0].mxu0 %vm361_vm1, %v345_v14  ;;  %p925_p11 = pnand %p924_p9, %p918_p10 }
 0x14a   : > { %v508_v16 = vpop.f32.mrb[0].mxu1 }
 0x14b   : > { %v509_v17 = vadd.f32 %v686_v15, %v508_v16  ;;  %v724_v18 = vpop.f32.mrb[1].mxu1  ;;  %v431_v19 = vpop.f32.mrb[0].mxu0 }
 0x14c   : > { %v713_v21 = vpop.f32.mrb[1].mxu0  ;;  %v432_v25 = vadd.f32 %v684_v24, %v431_v19 }
 0x14d   : > { %v688_v20 = vmul.f32 -1.442695, %v509_v17 }
 0x14f   : > { %825 = vpow2.f32 %v688_v20 }
 0x159   : > { %v826_v22 = vpop.eup %825 }
 0x15a   : > { %v515_v23 = vadd.f32 1.0, %v826_v22 }
 0x15c   : > { %827 = vrcp.f32 %v515_v23 }
 0x166   : > { %v828_v26 = vpop.eup %827 }
 0x167   : > { %v518_v27 = vmul.f32 %v828_v26, %v432_v25 }
 0x169   : > { %519 = vst [vmem:[%s336_s9] sm:$0xff] %v518_v27 }
 0x16a   : > { %928 = shalt.err (!%p925_p11)
}
 0x16b   : > { %s929_s13 = scalar_lea.hbm %s1253_s14, 128  ;;  %s933_s30 = scalar_lea.hbm %s1307_s5, 256 }
 0x16c   : > { %p930_p0 = scmp.ne.s32.totalorder %s1253_s14, %s929_s13  ;;  %p934_p6 = scmp.lt.u32.totalorder %s1253_s14, %s1307_s5 }
 0x16d   : > { %p935_p7 = scmp.lt.u32.totalorder %s933_s30, %s929_s13  ;;  %p937_p8 = scmp.lt.u32.totalorder %s929_s13, %s1253_s14 }
 0x16e   : > { %p931_p4 = pnand %p930_p0, %p1322_p12 }
 0x16f   : > { %p936_p2 = por %p935_p7, %p934_p6 }
 0x170   : > { %p932_p13 = pneg %p931_p4 }
 0x171   : > { %p938_p1 = por %p937_p8, %p936_p2 }
 0x173   : > { %p939_p10 = pnand %p938_p1, %p932_p13 }
 0x175   : > { %942 = shalt.err (!%p939_p10)
}
 0x176   : > { %747 = dma.vmem_to_hbm [thread:$0]  (%p1322_p12), %s1255_s11, 128, %s1253_s14, %s521_s10  }
 0x177 PF: > { %s547_s9 = sand.u32 1, %s981_s18   ;;  %p1323_p3 = scmp.ne.s32.totalorder %s1315_s29, 0 }
 0x178   : > { %p1324_p5 = scmp.ge.s32.totalorder %s1001_s23, 2  ;;  %s548_s15 = scalar_lea.sflag [#allocation4], %s547_s9 }
 0x17a   : > { %p761_p9 = pnand %p1324_p5, %p1323_p3 }
 0x17c   : > { %976 = dma.done.wait (!%p761_p9), %s548_s15, 128  }
 0x17d   : > { %978 = vsyncadd (!%p761_p9), %s548_s15, 4294967168  ;;  %s22_s23 = sadd.s32 1, %s1001_s23   ;;  %s1325_s18 = smov %s985_s19 }
 0x17e   : > { %p19_p11 = scmp.ge.s32.totalorder %s22_s23, 4   ;;  %s1326_s19 = smov %s989_s20 }
 0x17f   : > { %s1327_s20 = smov %s1184_s6  ;;  %s1328_s21 = smov %s997_s22 }
 0x180   : > { %s1329_s22 = smov %s1331_s12  ;;  %21 = sbr.rel (!%p19_p11) target bundleno = 7 (0x7), region = 101 }
 0x187   :  { %553 = vsyncpa [#allocation3], 1 }
 0x188   :  { %555 = vsyncpa [#allocation3 + $0x1], 1 }
 0x189   :  { %556 = vsyncpa [#allocation6], 1 }
 0x18a   :  { %557 = vsyncpa [#allocation4], 1 }
 0x18b   :  { %559 = vsyncpa [#allocation4 + $0x1], 1 }

</bundles_post_ra>
